<compile_context>
chip_gen: v5e
topology: v5e:2x2
jax: 0.10.0
libtpu: 0.0.40
codegen_flags: <defaults>
</compile_context>

<pallas_src>
import functools
import math

import jax
import jax.numpy as jnp
from jax.experimental import pallas as pl
from jax.experimental.pallas import tpu as pltpu

_VMEM_LIMIT = 48 * 1024 * 1024  # explicit budget: fits v7x 64 MiB, > v5e/v6e scoped defaults


def _tile(dim, default):
    """Tile size: full dim if it fits, else the (8/128-aligned) default."""
    return dim if dim <= default else default


# ---------------------------------------------------------------------------
# Kernel 1: tiled linear + bias   y = x @ W^T + b     (f32 accumulate)
# ---------------------------------------------------------------------------
def _linear_bias_kernel(x_ref, wt_ref, b_ref, o_ref):
    acc = jnp.dot(x_ref[...], wt_ref[...], preferred_element_type=jnp.float32)
    o_ref[...] = (acc + b_ref[...]).astype(o_ref.dtype)


def linear_bias(x2d, w, b, *, mxu_dtype=None, tm=256, tn=512):
    """x2d: (M, K); w: (N, K) torch layout; b: (N,). Returns (M, N) f32."""
    M, K = x2d.shape
    N = w.shape[0]
    wt = jnp.swapaxes(w, 0, 1)  # (K, N)
    if mxu_dtype is not None:
        x2d = x2d.astype(mxu_dtype)
        wt = wt.astype(mxu_dtype)
    b2 = b.reshape(1, N).astype(jnp.float32)
    tm = _tile(M, tm)
    tn = _tile(N, tn)
    grid = (pl.cdiv(M, tm), pl.cdiv(N, tn))
    cost = pl.CostEstimate(
        flops=2 * M * K * N,
        transcendentals=0,
        bytes_accessed=(M * K + K * N) * x2d.dtype.itemsize + (N + M * N) * 4)
    return pl.pallas_call(
        _linear_bias_kernel,
        out_shape=jax.ShapeDtypeStruct((M, N), jnp.float32),
        grid=grid,
        in_specs=[
            pl.BlockSpec((tm, K), lambda i, j: (i, 0)),
            pl.BlockSpec((K, tn), lambda i, j: (0, j)),
            pl.BlockSpec((1, tn), lambda i, j: (0, j)),
        ],
        out_specs=pl.BlockSpec((tm, tn), lambda i, j: (i, j)),
        compiler_params=pltpu.CompilerParams(
            dimension_semantics=("parallel", "parallel"),
            vmem_limit_bytes=_VMEM_LIMIT),
        cost_estimate=cost,
    )(x2d, wt, b2)


# ---------------------------------------------------------------------------
# Kernel 2: Overparam gated linear   out = sigmoid(x Wf^T + bf) * tanh(x Wc^T + bc)
# (fused weight split into c/f halves; epilogue in f32)
# ---------------------------------------------------------------------------
def _gated_linear_kernel(x_ref, wct_ref, wft_ref, bc_ref, bf_ref, o_ref):
    x = x_ref[...]
    c = jnp.dot(x, wct_ref[...], preferred_element_type=jnp.float32) + bc_ref[...]
    f = jnp.dot(x, wft_ref[...], preferred_element_type=jnp.float32) + bf_ref[...]
    o_ref[...] = (jax.nn.sigmoid(f) * jnp.tanh(c)).astype(o_ref.dtype)


def gated_linear(x2d, w, b, *, mxu_dtype=None, tm=256, tn=512):
    """x2d: (M, K); w: (2*n, K) torch layout; b: (2*n,). Returns (M, n) f32."""
    M, K = x2d.shape
    n = w.shape[0] // 2
    wct = jnp.swapaxes(w[:n], 0, 1)   # (K, n)  tanh branch
    wft = jnp.swapaxes(w[n:], 0, 1)   # (K, n)  sigmoid gate
    if mxu_dtype is not None:
        x2d = x2d.astype(mxu_dtype)
        wct = wct.astype(mxu_dtype)
        wft = wft.astype(mxu_dtype)
    bc = b[:n].reshape(1, n).astype(jnp.float32)
    bf = b[n:].reshape(1, n).astype(jnp.float32)
    tm = _tile(M, tm)
    tn = _tile(n, tn)
    grid = (pl.cdiv(M, tm), pl.cdiv(n, tn))
    cost = pl.CostEstimate(
        flops=4 * M * K * n,
        transcendentals=2 * M * n,
        bytes_accessed=(M * K + 2 * K * n) * x2d.dtype.itemsize + (2 * n + M * n) * 4)
    return pl.pallas_call(
        _gated_linear_kernel,
        out_shape=jax.ShapeDtypeStruct((M, n), jnp.float32),
        grid=grid,
        in_specs=[
            pl.BlockSpec((tm, K), lambda i, j: (i, 0)),
            pl.BlockSpec((K, tn), lambda i, j: (0, j)),
            pl.BlockSpec((K, tn), lambda i, j: (0, j)),
            pl.BlockSpec((1, tn), lambda i, j: (0, j)),
            pl.BlockSpec((1, tn), lambda i, j: (0, j)),
        ],
        out_specs=pl.BlockSpec((tm, tn), lambda i, j: (i, j)),
        compiler_params=pltpu.CompilerParams(
            dimension_semantics=("parallel", "parallel"),
            vmem_limit_bytes=_VMEM_LIMIT),
        cost_estimate=cost,
    )(x2d, wct, wft, bc, bf)


# ---------------------------------------------------------------------------
# Kernel 3: LayerNorm (eps inside sqrt, biased var) fused with the qs gate
# ---------------------------------------------------------------------------
def _ln_scale_kernel(y_ref, g_ref, b_ref, s_ref, o_ref, *, eps):
    y = y_ref[...].astype(jnp.float32)
    mu = jnp.mean(y, axis=-1, keepdims=True)
    d = y - mu
    var = jnp.mean(d * d, axis=-1, keepdims=True)
    yhat = d / jnp.sqrt(var + eps)
    o_ref[...] = ((yhat * g_ref[...] + b_ref[...]) * s_ref[...]).astype(o_ref.dtype)


def layernorm_scale(y, gamma, beta, scale, *, eps=1e-12, tm=256):
    M, N = y.shape
    tm = _tile(M, tm)
    g = gamma.reshape(1, N).astype(jnp.float32)
    b = beta.reshape(1, N).astype(jnp.float32)
    s = scale.reshape(1, N).astype(jnp.float32)
    cost = pl.CostEstimate(flops=8 * M * N, transcendentals=M,
                           bytes_accessed=(2 * M * N + 3 * N) * 4)
    return pl.pallas_call(
        functools.partial(_ln_scale_kernel, eps=eps),
        out_shape=jax.ShapeDtypeStruct((M, N), jnp.float32),
        grid=(pl.cdiv(M, tm),),
        in_specs=[
            pl.BlockSpec((tm, N), lambda i: (i, 0)),
            pl.BlockSpec((1, N), lambda i: (0, 0)),
            pl.BlockSpec((1, N), lambda i: (0, 0)),
            pl.BlockSpec((1, N), lambda i: (0, 0)),
        ],
        out_specs=pl.BlockSpec((tm, N), lambda i: (i, 0)),
        compiler_params=pltpu.CompilerParams(
            dimension_semantics=("parallel",),
            vmem_limit_bytes=_VMEM_LIMIT),
        cost_estimate=cost,
    )(y, g, b, s)


# ---------------------------------------------------------------------------
# Kernel 4: scaled-dot-product attention, returning (mix, weights).
# ks/vs per-feature gates are fused into the kernel (saves an HBM round trip).
# ---------------------------------------------------------------------------
def _attention_kernel(q_ref, k_ref, v_ref, ks_ref, vs_ref, mix_ref, w_ref, *, scale):
    q = q_ref[...].astype(jnp.float32)                       # (tq, dh)
    k = k_ref[...].astype(jnp.float32) * ks_ref[...]         # (Lk, dh)
    v = v_ref[...].astype(jnp.float32) * vs_ref[...]         # (Lk, dh)
    s = jax.lax.dot_general(q, k, (((1,), (1,)), ((), ())),
                            preferred_element_type=jnp.float32) * scale   # (tq, Lk)
    m = jnp.max(s, axis=-1, keepdims=True)
    e = jnp.exp(s - m)
    w = e / jnp.sum(e, axis=-1, keepdims=True)
    mix_ref[...] = jnp.dot(w, v, preferred_element_type=jnp.float32).astype(mix_ref.dtype)
    w_ref[...] = w.astype(w_ref.dtype)


def scaled_attention(q4, k4, v4, ks_h, vs_h, *, tq=128):
    """q4,k4,v4: (B,H,L,dh); ks_h,vs_h: (H,1,dh). Returns mix (B,H,Lq,dh), w (B,H,Lq,Lk)."""
    B, H, Lq, dh = q4.shape
    Lk = k4.shape[2]
    tq = _tile(Lq, tq)
    scale = 1.0 / math.sqrt(dh)
    grid = (B, H, pl.cdiv(Lq, tq))
    cost = pl.CostEstimate(
        flops=4 * B * H * Lq * Lk * dh,
        transcendentals=B * H * Lq * Lk,
        bytes_accessed=4 * (B * H * (2 * Lq * dh + 2 * Lk * dh + Lq * Lk) + 2 * H * dh))
    mix, w = pl.pallas_call(
        functools.partial(_attention_kernel, scale=scale),
        out_shape=(jax.ShapeDtypeStruct((B, H, Lq, dh), jnp.float32),
                   jax.ShapeDtypeStruct((B, H, Lq, Lk), jnp.float32)),
        grid=grid,
        in_specs=[
            pl.BlockSpec((None, None, tq, dh), lambda b, h, i: (b, h, i, 0)),
            pl.BlockSpec((None, None, Lk, dh), lambda b, h, i: (b, h, 0, 0)),
            pl.BlockSpec((None, None, Lk, dh), lambda b, h, i: (b, h, 0, 0)),
            pl.BlockSpec((None, 1, dh), lambda b, h, i: (h, 0, 0)),
            pl.BlockSpec((None, 1, dh), lambda b, h, i: (h, 0, 0)),
        ],
        out_specs=(
            pl.BlockSpec((None, None, tq, dh), lambda b, h, i: (b, h, i, 0)),
            pl.BlockSpec((None, None, tq, Lk), lambda b, h, i: (b, h, i, 0)),
        ),
        compiler_params=pltpu.CompilerParams(
            dimension_semantics=("parallel", "parallel", "parallel"),
            vmem_limit_bytes=_VMEM_LIMIT),
        cost_estimate=cost,
    )(q4, k4, v4, ks_h, vs_h)
    return mix, w


# ---------------------------------------------------------------------------
# Full Attention.forward (defaults: q-proj + qln on, k/v/r projections off)
# ---------------------------------------------------------------------------
@functools.partial(jax.jit, static_argnames=("heads", "batch_first", "mxu_dtype"))
def attention_forward(query, key, value, params, *, heads=1, attn_mask=None,
                      batch_first=False, mxu_dtype=None):
    if attn_mask is not None:
        # TODO(synk): attn_mask addition (and attention dropout) not implemented;
        # module default is attn_mask=None, dropout=None.
        raise NotImplementedError("attn_mask is not supported in the Pallas path")

    nhid = query.shape[-1]
    assert nhid % heads == 0
    dh = nhid // heads

    qs_gate = jax.nn.sigmoid(params["qs"]).reshape(1, nhid)
    ks_gate = jax.nn.sigmoid(params["ks"]).reshape(heads, 1, dh)
    vs_sig = jax.nn.sigmoid(params["vs"]).reshape(1, nhid)

    # vq = Overparam(sigmoid(vs))  -> per-feature value gate
    vs_gate = gated_linear(vs_sig, params["w_vq"], params["b_vq"],
                           mxu_dtype=mxu_dtype).reshape(heads, 1, dh)

    # q = sigmoid(qs) * LayerNorm(query @ Wq^T + bq)
    lead = query.shape[:-1]
    x2d = query.reshape(-1, nhid)
    y = linear_bias(x2d, params["w_q"], params["b_q"], mxu_dtype=mxu_dtype)
    qn = layernorm_scale(y, params["ln_g"], params["ln_b"], qs_gate, eps=1e-12)
    qh = qn.reshape(*lead, nhid)

    if not batch_first:   # inputs are (L, B, nhid)
        qh = jnp.swapaxes(qh, 0, 1)
        kb = jnp.swapaxes(key, 0, 1)
        vb = jnp.swapaxes(value, 0, 1)
    else:
        kb, vb = key, value

    B, Lq, _ = qh.shape
    Lk = kb.shape[1]
    q4 = qh.reshape(B, Lq, heads, dh).transpose(0, 2, 1, 3)
    k4 = kb.reshape(B, Lk, heads, dh).transpose(0, 2, 1, 3)
    v4 = vb.reshape(B, Lk, heads, dh).transpose(0, 2, 1, 3)

    mix4, focus = scaled_attention(q4, k4, v4, ks_gate, vs_gate)

    mix = mix4.transpose(0, 2, 1, 3).reshape(B, Lq, nhid)
    if not batch_first:
        mix = jnp.swapaxes(mix, 0, 1)
    return mix.astype(query.dtype), focus


# ---------------------------------------------------------------------------
# Pure-JAX reference mirroring the PyTorch forward
# ---------------------------------------------------------------------------
def _reference_forward(query, key, value, p, heads=1):
    nhid = query.shape[-1]
    dh = nhid // heads
    qs = jax.nn.sigmoid(p["qs"])
    ks = jax.nn.sigmoid(p["ks"])
    vs = jax.nn.sigmoid(p["vs"])
    z = vs @ p["w_vq"].T + p["b_vq"]
    c, f = z[..., :nhid], z[..., nhid:]
    vs = jax.nn.sigmoid(f) * jnp.tanh(c)
    q = query @ p["w_q"].T + p["b_q"]
    mu = q.mean(-1, keepdims=True)
    var = ((q - mu) ** 2).mean(-1, keepdims=True)
    q = (q - mu) / jnp.sqrt(var + 1e-12) * p["ln_g"] + p["ln_b"]
    q, k, v = qs * q, ks * key, vs * value
    q, k, v = (jnp.swapaxes(t, 0, 1) for t in (q, k, v))
    B, Lq, _ = q.shape
    Lk = k.shape[1]
    q = q.reshape(B, Lq, heads, dh).transpose(0, 2, 1, 3)
    k = k.reshape(B, Lk, heads, dh).transpose(0, 2, 1, 3)
    v = v.reshape(B, Lk, heads, dh).transpose(0, 2, 1, 3)
    s = jnp.einsum("bhqd,bhkd->bhqk", q, k) / math.sqrt(dh)
    w = jax.nn.softmax(s, axis=-1)
    mix = jnp.einsum("bhqk,bhkd->bhqd", w, v)
    mix = mix.transpose(0, 2, 1, 3).reshape(B, Lq, nhid)
    return jnp.swapaxes(mix, 0, 1), w


if __name__ == "__main__":
    nhid, heads = 128, 1          # lane-dense feature dim (multiple of 128)
    seq, batch = 8, 2             # inputs are (seq, batch, nhid): batch_first=False

    root = jax.random.PRNGKey(0)
    ks_ = jax.random.split(root, 10)
    bound = 1.0 / math.sqrt(nhid)
    params = {
        "qs": 0.1 * jax.random.normal(ks_[0], (1, 1, nhid), jnp.float32),
        "ks": 0.1 * jax.random.normal(ks_[1], (1, 1, nhid), jnp.float32),
        "vs": 0.1 * jax.random.normal(ks_[2], (1, 1, nhid), jnp.float32),
        "w_q": jax.random.uniform(ks_[3], (nhid, nhid), jnp.float32, -bound, bound),
        "b_q": jax.random.uniform(ks_[4], (nhid,), jnp.float32, -bound, bound),
        "ln_g": jnp.ones((nhid,), jnp.float32),
        "ln_b": jnp.zeros((nhid,), jnp.float32),
        "w_vq": jax.random.uniform(ks_[5], (2 * nhid, nhid), jnp.float32, -bound, bound),
        "b_vq": jax.random.uniform(ks_[6], (2 * nhid,), jnp.float32, -bound, bound),
    }
    query = jax.random.normal(ks_[7], (seq, batch, nhid), jnp.float32)
    key_in = jax.random.normal(ks_[8], (seq, batch, nhid), jnp.float32)
    value = jax.random.normal(ks_[9], (seq, batch, nhid), jnp.float32)

    mix, focus = attention_forward(query, key_in, value, params, heads=heads)
    mix, focus = jax.block_until_ready((mix, focus))

    with jax.default_matmul_precision("highest"):
        ref_mix, ref_focus = _reference_forward(query, key_in, value, params, heads=heads)
    ref_mix, ref_focus = jax.block_until_ready((ref_mix, ref_focus))

    assert mix.shape == (seq, batch, nhid)
    assert focus.shape == (batch, heads, seq, seq)
    assert jnp.allclose(mix, ref_mix, atol=5e-5, rtol=5e-5)
    assert jnp.allclose(focus, ref_focus, atol=5e-5, rtol=5e-5)

    # bf16-MXU fast path (f32 accumulate + f32 epilogue): smoke test only.
    mix_bf16, focus_bf16 = attention_forward(query, key_in, value, params,
                                             heads=heads, mxu_dtype=jnp.bfloat16)
    mix_bf16 = jax.block_until_ready(mix_bf16)
    assert mix_bf16.shape == mix.shape
    assert bool(jnp.all(jnp.isfinite(mix_bf16)))

    print("KERNEL_OK")
</pallas_src>

<mosaic_0001>
module attributes {stable_mosaic.version = 11 : i64} {
  func.func @_ln_scale_kernel(%arg0: i32, %arg1: memref<16x128xf32, #tpu.memory_space<vmem>>, %arg2: memref<1x128xf32, #tpu.memory_space<vmem>>, %arg3: memref<1x128xf32, #tpu.memory_space<vmem>>, %arg4: memref<1x128xf32, #tpu.memory_space<vmem>>, %arg5: memref<16x128xf32, #tpu.memory_space<vmem>>) attributes {dimension_semantics = [#tpu.dimension_semantics<parallel>], iteration_bounds = array<i64: 1>, scalar_prefetch = 0 : i64, scratch_operands = 0 : i64, tpu.core_type = #tpu.core_type<tc>, window_params = [{transform_indices = @transform_0, window_bounds = array<i64: 16, 128>}, {pipeline_mode = #tpu.pipeline_mode<synchronous>, transform_indices = @transform_1, window_bounds = array<i64: 1, 128>}, {pipeline_mode = #tpu.pipeline_mode<synchronous>, transform_indices = @transform_2, window_bounds = array<i64: 1, 128>}, {pipeline_mode = #tpu.pipeline_mode<synchronous>, transform_indices = @transform_3, window_bounds = array<i64: 1, 128>}, {transform_indices = @transform_4, window_bounds = array<i64: 16, 128>}]} {
    %c0 = arith.constant 0 : index
    %c0_0 = arith.constant 0 : index
    %0 = vector.load %arg1[%c0, %c0_0] : memref<16x128xf32, #tpu.memory_space<vmem>>, vector<16x128xf32>
    %cst = arith.constant dense<0.000000e+00> : vector<16xf32>
    %1 = vector.multi_reduction <add>, %0, %cst [1] : vector<16x128xf32> to vector<16xf32>
    %2 = vector.shape_cast %1 : vector<16xf32> to vector<16x1xf32>
    %cst_1 = arith.constant 1.280000e+02 : f32
    %3 = vector.broadcast %cst_1 : f32 to vector<16x1xf32>
    %4 = arith.divf %2, %3 : vector<16x1xf32>
    %5 = vector.broadcast %4 : vector<16x1xf32> to vector<16x128xf32>
    %6 = arith.subf %0, %5 : vector<16x128xf32>
    %7 = arith.mulf %6, %6 : vector<16x128xf32>
    %cst_2 = arith.constant dense<0.000000e+00> : vector<16xf32>
    %8 = vector.multi_reduction <add>, %7, %cst_2 [1] : vector<16x128xf32> to vector<16xf32>
    %9 = vector.shape_cast %8 : vector<16xf32> to vector<16x1xf32>
    %cst_3 = arith.constant 1.280000e+02 : f32
    %10 = vector.broadcast %cst_3 : f32 to vector<16x1xf32>
    %11 = arith.divf %9, %10 : vector<16x1xf32>
    %cst_4 = arith.constant 9.99999996E-13 : f32
    %12 = vector.broadcast %cst_4 : f32 to vector<16x1xf32>
    %13 = arith.addf %11, %12 : vector<16x1xf32>
    %14 = math.sqrt %13 : vector<16x1xf32>
    %15 = vector.broadcast %14 : vector<16x1xf32> to vector<16x128xf32>
    %16 = arith.divf %6, %15 : vector<16x128xf32>
    %c0_5 = arith.constant 0 : index
    %c0_6 = arith.constant 0 : index
    %17 = vector.load %arg2[%c0_5, %c0_6] : memref<1x128xf32, #tpu.memory_space<vmem>>, vector<1x128xf32>
    %18 = vector.broadcast %17 : vector<1x128xf32> to vector<16x128xf32>
    %19 = arith.mulf %16, %18 : vector<16x128xf32>
    %c0_7 = arith.constant 0 : index
    %c0_8 = arith.constant 0 : index
    %20 = vector.load %arg3[%c0_7, %c0_8] : memref<1x128xf32, #tpu.memory_space<vmem>>, vector<1x128xf32>
    %21 = vector.broadcast %20 : vector<1x128xf32> to vector<16x128xf32>
    %22 = arith.addf %19, %21 : vector<16x128xf32>
    %c0_9 = arith.constant 0 : index
    %c0_10 = arith.constant 0 : index
    %23 = vector.load %arg4[%c0_9, %c0_10] : memref<1x128xf32, #tpu.memory_space<vmem>>, vector<1x128xf32>
    %24 = vector.broadcast %23 : vector<1x128xf32> to vector<16x128xf32>
    %25 = arith.mulf %22, %24 : vector<16x128xf32>
    %c0_11 = arith.constant 0 : index
    %c0_12 = arith.constant 0 : index
    %26 = vector.load %arg5[%c0_11, %c0_12] : memref<16x128xf32, #tpu.memory_space<vmem>>, vector<16x128xf32>
    tpu.vector_store %arg5[%c0_11, %c0_12], %25 {strides = array<i32>} : memref<16x128xf32, #tpu.memory_space<vmem>>, vector<16x128xf32>,
    return
  }
  func.func @transform_0(%arg0: i32) -> (i32, i32) {
    %c0_i32 = arith.constant 0 : i32
    %c0_i32_0 = arith.constant 0 : i32
    return %arg0, %c0_i32 : i32, i32
  }
  func.func @transform_1(%arg0: i32) -> (i32, i32) {
    %c0_i32 = arith.constant 0 : i32
    %c0_i32_0 = arith.constant 0 : i32
    %c0_i32_1 = arith.constant 0 : i32
    return %c0_i32, %c0_i32_0 : i32, i32
  }
  func.func @transform_2(%arg0: i32) -> (i32, i32) {
    %c0_i32 = arith.constant 0 : i32
    %c0_i32_0 = arith.constant 0 : i32
    %c0_i32_1 = arith.constant 0 : i32
    return %c0_i32, %c0_i32_0 : i32, i32
  }
  func.func @transform_3(%arg0: i32) -> (i32, i32) {
    %c0_i32 = arith.constant 0 : i32
    %c0_i32_0 = arith.constant 0 : i32
    %c0_i32_1 = arith.constant 0 : i32
    return %c0_i32, %c0_i32_0 : i32, i32
  }
  func.func @transform_4(%arg0: i32) -> (i32, i32) {
    %c0_i32 = arith.constant 0 : i32
    %c0_i32_0 = arith.constant 0 : i32
    return %arg0, %c0_i32 : i32, i32
  }
}

module attributes {stable_mosaic.version = 11 : i64} {
  func.func @_linear_bias_kernel(%arg0: i32, %arg1: i32, %arg2: memref<16x128xf32, #tpu.memory_space<vmem>>, %arg3: memref<128x128xf32, #tpu.memory_space<vmem>>, %arg4: memref<1x128xf32, #tpu.memory_space<vmem>>, %arg5: memref<16x128xf32, #tpu.memory_space<vmem>>) attributes {dimension_semantics = [#tpu.dimension_semantics<parallel>, #tpu.dimension_semantics<parallel>], iteration_bounds = array<i64: 1, 1>, scalar_prefetch = 0 : i64, scratch_operands = 0 : i64, tpu.core_type = #tpu.core_type<tc>, window_params = [{transform_indices = @transform_0, window_bounds = array<i64: 16, 128>}, {transform_indices = @transform_1, window_bounds = array<i64: 128, 128>}, {transform_indices = @transform_2, window_bounds = array<i64: 1, 128>}, {transform_indices = @transform_3, window_bounds = array<i64: 16, 128>}]} {
    %c0 = arith.constant 0 : index
    %c0_0 = arith.constant 0 : index
    %0 = vector.load %arg2[%c0, %c0_0] : memref<16x128xf32, #tpu.memory_space<vmem>>, vector<16x128xf32>
    %c0_1 = arith.constant 0 : index
    %c0_2 = arith.constant 0 : index
    %1 = vector.load %arg3[%c0_1, %c0_2] : memref<128x128xf32, #tpu.memory_space<vmem>>, vector<128x128xf32>
    %cst = arith.constant dense<0.000000e+00> : vector<16x128xf32>
    %2 = tpu.matmul %0, %1, %cst {dimension_numbers = #tpu.dot_dimension_numbers<[1], [0], [0], [1], [0, 0, 1, 1], [], []>} : vector<16x128xf32>, vector<128x128xf32>, vector<16x128xf32> -> vector<16x128xf32>
    %c0_3 = arith.constant 0 : index
    %c0_4 = arith.constant 0 : index
    %3 = vector.load %arg4[%c0_3, %c0_4] : memref<1x128xf32, #tpu.memory_space<vmem>>, vector<1x128xf32>
    %4 = vector.broadcast %3 : vector<1x128xf32> to vector<16x128xf32>
    %5 = arith.addf %2, %4 : vector<16x128xf32>
    %c0_5 = arith.constant 0 : index
    %c0_6 = arith.constant 0 : index
    %6 = vector.load %arg5[%c0_5, %c0_6] : memref<16x128xf32, #tpu.memory_space<vmem>>, vector<16x128xf32>
    tpu.vector_store %arg5[%c0_5, %c0_6], %5 {strides = array<i32>} : memref<16x128xf32, #tpu.memory_space<vmem>>, vector<16x128xf32>,
    return
  }
  func.func @transform_0(%arg0: i32, %arg1: i32) -> (i32, i32) {
    %c0_i32 = arith.constant 0 : i32
    %c0_i32_0 = arith.constant 0 : i32
    return %arg0, %c0_i32 : i32, i32
  }
  func.func @transform_1(%arg0: i32, %arg1: i32) -> (i32, i32) {
    %c0_i32 = arith.constant 0 : i32
    %c0_i32_0 = arith.constant 0 : i32
    return %c0_i32, %arg1 : i32, i32
  }
  func.func @transform_2(%arg0: i32, %arg1: i32) -> (i32, i32) {
    %c0_i32 = arith.constant 0 : i32
    %c0_i32_0 = arith.constant 0 : i32
    return %c0_i32, %arg1 : i32, i32
  }
  func.func @transform_3(%arg0: i32, %arg1: i32) -> (i32, i32) {
    %c0_i32 = arith.constant 0 : i32
    return %arg0, %arg1 : i32, i32
  }
}

module attributes {stable_mosaic.version = 11 : i64} {
  func.func @_gated_linear_kernel(%arg0: i32, %arg1: i32, %arg2: memref<1x128xf32, #tpu.memory_space<vmem>>, %arg3: memref<128x128xf32, #tpu.memory_space<vmem>>, %arg4: memref<128x128xf32, #tpu.memory_space<vmem>>, %arg5: memref<1x128xf32, #tpu.memory_space<vmem>>, %arg6: memref<1x128xf32, #tpu.memory_space<vmem>>, %arg7: memref<1x128xf32, #tpu.memory_space<vmem>>) attributes {dimension_semantics = [#tpu.dimension_semantics<parallel>, #tpu.dimension_semantics<parallel>], iteration_bounds = array<i64: 1, 1>, scalar_prefetch = 0 : i64, scratch_operands = 0 : i64, tpu.core_type = #tpu.core_type<tc>, window_params = [{transform_indices = @transform_0, window_bounds = array<i64: 1, 128>}, {transform_indices = @transform_1, window_bounds = array<i64: 128, 128>}, {transform_indices = @transform_2, window_bounds = array<i64: 128, 128>}, {transform_indices = @transform_3, window_bounds = array<i64: 1, 128>}, {transform_indices = @transform_4, window_bounds = array<i64: 1, 128>}, {transform_indices = @transform_5, window_bounds = array<i64: 1, 128>}]} {
    %c0 = arith.constant 0 : index
    %c0_0 = arith.constant 0 : index
    %0 = vector.load %arg2[%c0, %c0_0] : memref<1x128xf32, #tpu.memory_space<vmem>>, vector<1x128xf32>
    %c0_1 = arith.constant 0 : index
    %c0_2 = arith.constant 0 : index
    %1 = vector.load %arg3[%c0_1, %c0_2] : memref<128x128xf32, #tpu.memory_space<vmem>>, vector<128x128xf32>
    %cst = arith.constant dense<0.000000e+00> : vector<1x128xf32>
    %2 = tpu.matmul %0, %1, %cst {dimension_numbers = #tpu.dot_dimension_numbers<[1], [0], [0], [1], [0, 0, 1, 1], [], []>} : vector<1x128xf32>, vector<128x128xf32>, vector<1x128xf32> -> vector<1x128xf32>
    %c0_3 = arith.constant 0 : index
    %c0_4 = arith.constant 0 : index
    %3 = vector.load %arg5[%c0_3, %c0_4] : memref<1x128xf32, #tpu.memory_space<vmem>>, vector<1x128xf32>
    %4 = arith.addf %2, %3 : vector<1x128xf32>
    %c0_5 = arith.constant 0 : index
    %c0_6 = arith.constant 0 : index
    %5 = vector.load %arg4[%c0_5, %c0_6] : memref<128x128xf32, #tpu.memory_space<vmem>>, vector<128x128xf32>
    %cst_7 = arith.constant dense<0.000000e+00> : vector<1x128xf32>
    %6 = tpu.matmul %0, %5, %cst_7 {dimension_numbers = #tpu.dot_dimension_numbers<[1], [0], [0], [1], [0, 0, 1, 1], [], []>} : vector<1x128xf32>, vector<128x128xf32>, vector<1x128xf32> -> vector<1x128xf32>
    %c0_8 = arith.constant 0 : index
    %c0_9 = arith.constant 0 : index
    %7 = vector.load %arg6[%c0_8, %c0_9] : memref<1x128xf32, #tpu.memory_space<vmem>>, vector<1x128xf32>
    %8 = arith.addf %6, %7 : vector<1x128xf32>
    %9 = arith.negf %8 : vector<1x128xf32>
    %10 = math.exp %9 : vector<1x128xf32>
    %cst_10 = arith.constant 1.000000e+00 : f32
    %11 = vector.broadcast %cst_10 : f32 to vector<1x128xf32>
    %12 = arith.addf %11, %10 : vector<1x128xf32>
    %13 = arith.divf %11, %12 : vector<1x128xf32>
    %14 = math.tanh %4 : vector<1x128xf32>
    %15 = arith.mulf %13, %14 : vector<1x128xf32>
    %c0_11 = arith.constant 0 : index
    %c0_12 = arith.constant 0 : index
    %16 = vector.load %arg7[%c0_11, %c0_12] : memref<1x128xf32, #tpu.memory_space<vmem>>, vector<1x128xf32>
    tpu.vector_store %arg7[%c0_11, %c0_12], %15 {strides = array<i32>} : memref<1x128xf32, #tpu.memory_space<vmem>>, vector<1x128xf32>,
    return
  }
  func.func @transform_0(%arg0: i32, %arg1: i32) -> (i32, i32) {
    %c0_i32 = arith.constant 0 : i32
    %c0_i32_0 = arith.constant 0 : i32
    return %arg0, %c0_i32 : i32, i32
  }
  func.func @transform_1(%arg0: i32, %arg1: i32) -> (i32, i32) {
    %c0_i32 = arith.constant 0 : i32
    %c0_i32_0 = arith.constant 0 : i32
    return %c0_i32, %arg1 : i32, i32
  }
  func.func @transform_2(%arg0: i32, %arg1: i32) -> (i32, i32) {
    %c0_i32 = arith.constant 0 : i32
    %c0_i32_0 = arith.constant 0 : i32
    return %c0_i32, %arg1 : i32, i32
  }
  func.func @transform_3(%arg0: i32, %arg1: i32) -> (i32, i32) {
    %c0_i32 = arith.constant 0 : i32
    %c0_i32_0 = arith.constant 0 : i32
    return %c0_i32, %arg1 : i32, i32
  }
  func.func @transform_4(%arg0: i32, %arg1: i32) -> (i32, i32) {
    %c0_i32 = arith.constant 0 : i32
    %c0_i32_0 = arith.constant 0 : i32
    return %c0_i32, %arg1 : i32, i32
  }
  func.func @transform_5(%arg0: i32, %arg1: i32) -> (i32, i32) {
    %c0_i32 = arith.constant 0 : i32
    return %arg0, %arg1 : i32, i32
  }
}

module attributes {stable_mosaic.version = 11 : i64} {
  func.func @_attention_kernel(%arg0: i32, %arg1: i32, %arg2: i32, %arg3: memref<1x1x8x128xf32, #tpu.memory_space<vmem>>, %arg4: memref<1x1x8x128xf32, #tpu.memory_space<vmem>>, %arg5: memref<1x1x8x128xf32, #tpu.memory_space<vmem>>, %arg6: memref<1x1x128xf32, #tpu.memory_space<vmem>>, %arg7: memref<1x1x128xf32, #tpu.memory_space<vmem>>, %arg8: memref<1x1x8x128xf32, #tpu.memory_space<vmem>>, %arg9: memref<1x1x8x8xf32, #tpu.memory_space<vmem>>) attributes {dimension_semantics = [#tpu.dimension_semantics<parallel>, #tpu.dimension_semantics<parallel>, #tpu.dimension_semantics<parallel>], iteration_bounds = array<i64: 2, 1, 1>, scalar_prefetch = 0 : i64, scratch_operands = 0 : i64, tpu.core_type = #tpu.core_type<tc>, window_params = [{transform_indices = @transform_0, window_bounds = array<i64: 1, 1, 8, 128>}, {transform_indices = @transform_1, window_bounds = array<i64: 1, 1, 8, 128>}, {transform_indices = @transform_2, window_bounds = array<i64: 1, 1, 8, 128>}, {transform_indices = @transform_3, window_bounds = array<i64: 1, 1, 128>}, {transform_indices = @transform_4, window_bounds = array<i64: 1, 1, 128>}, {transform_indices = @transform_5, window_bounds = array<i64: 1, 1, 8, 128>}, {transform_indices = @transform_6, window_bounds = array<i64: 1, 1, 8, 8>}]} {
    %c0 = arith.constant 0 : index
    %c0_0 = arith.constant 0 : index
    %c0_1 = arith.constant 0 : index
    %c0_2 = arith.constant 0 : index
    %0 = vector.load %arg3[%c0, %c0_0, %c0_1, %c0_2] : memref<1x1x8x128xf32, #tpu.memory_space<vmem>>, vector<1x1x8x128xf32>
    %1 = vector.shape_cast %0 : vector<1x1x8x128xf32> to vector<8x128xf32>
    %c0_3 = arith.constant 0 : index
    %c0_4 = arith.constant 0 : index
    %c0_5 = arith.constant 0 : index
    %c0_6 = arith.constant 0 : index
    %2 = vector.load %arg4[%c0_3, %c0_4, %c0_5, %c0_6] : memref<1x1x8x128xf32, #tpu.memory_space<vmem>>, vector<1x1x8x128xf32>
    %3 = vector.shape_cast %2 : vector<1x1x8x128xf32> to vector<8x128xf32>
    %c0_7 = arith.constant 0 : index
    %c0_8 = arith.constant 0 : index
    %c0_9 = arith.constant 0 : index
    %4 = vector.load %arg6[%c0_7, %c0_8, %c0_9] : memref<1x1x128xf32, #tpu.memory_space<vmem>>, vector<1x1x128xf32>
    %5 = vector.shape_cast %4 : vector<1x1x128xf32> to vector<1x128xf32>
    %6 = vector.broadcast %5 : vector<1x128xf32> to vector<8x128xf32>
    %7 = arith.mulf %3, %6 : vector<8x128xf32>
    %c0_10 = arith.constant 0 : index
    %c0_11 = arith.constant 0 : index
    %c0_12 = arith.constant 0 : index
    %c0_13 = arith.constant 0 : index
    %8 = vector.load %arg5[%c0_10, %c0_11, %c0_12, %c0_13] : memref<1x1x8x128xf32, #tpu.memory_space<vmem>>, vector<1x1x8x128xf32>
    %9 = vector.shape_cast %8 : vector<1x1x8x128xf32> to vector<8x128xf32>
    %c0_14 = arith.constant 0 : index
    %c0_15 = arith.constant 0 : index
    %c0_16 = arith.constant 0 : index
    %10 = vector.load %arg7[%c0_14, %c0_15, %c0_16] : memref<1x1x128xf32, #tpu.memory_space<vmem>>, vector<1x1x128xf32>
    %11 = vector.shape_cast %10 : vector<1x1x128xf32> to vector<1x128xf32>
    %12 = vector.broadcast %11 : vector<1x128xf32> to vector<8x128xf32>
    %13 = arith.mulf %9, %12 : vector<8x128xf32>
    %cst = arith.constant dense<0.000000e+00> : vector<8x8xf32>
    %14 = tpu.matmul %1, %7, %cst {dimension_numbers = #tpu.dot_dimension_numbers<[1], [1], [0], [0], [0, 0, 1, 0], [], []>} : vector<8x128xf32>, vector<8x128xf32>, vector<8x8xf32> -> vector<8x8xf32>
    %cst_17 = arith.constant 0.0883883461 : f32
    %15 = vector.broadcast %cst_17 : f32 to vector<8x8xf32>
    %16 = arith.mulf %14, %15 : vector<8x8xf32>
    %cst_18 = arith.constant dense<0xFF800000> : vector<8xf32>
    %17 = vector.multi_reduction <maximumf>, %16, %cst_18 [1] : vector<8x8xf32> to vector<8xf32>
    %18 = vector.shape_cast %17 : vector<8xf32> to vector<8x1xf32>
    %19 = vector.broadcast %18 : vector<8x1xf32> to vector<8x8xf32>
    %20 = arith.subf %16, %19 : vector<8x8xf32>
    %21 = math.exp %20 : vector<8x8xf32>
    %cst_19 = arith.constant dense<0.000000e+00> : vector<8xf32>
    %22 = vector.multi_reduction <add>, %21, %cst_19 [1] : vector<8x8xf32> to vector<8xf32>
    %23 = vector.shape_cast %22 : vector<8xf32> to vector<8x1xf32>
    %24 = vector.broadcast %23 : vector<8x1xf32> to vector<8x8xf32>
    %25 = arith.divf %21, %24 : vector<8x8xf32>
    %cst_20 = arith.constant dense<0.000000e+00> : vector<8x128xf32>
    %26 = tpu.matmul %25, %13, %cst_20 {dimension_numbers = #tpu.dot_dimension_numbers<[1], [0], [0], [1], [0, 0, 1, 1], [], []>} : vector<8x8xf32>, vector<8x128xf32>, vector<8x128xf32> -> vector<8x128xf32>
    %c0_21 = arith.constant 0 : index
    %c0_22 = arith.constant 0 : index
    %c0_23 = arith.constant 0 : index
    %c0_24 = arith.constant 0 : index
    %27 = vector.load %arg8[%c0_21, %c0_22, %c0_23, %c0_24] : memref<1x1x8x128xf32, #tpu.memory_space<vmem>>, vector<1x1x8x128xf32>
    %28 = vector.shape_cast %27 : vector<1x1x8x128xf32> to vector<8x128xf32>
    %29 = vector.shape_cast %26 : vector<8x128xf32> to vector<1x1x8x128xf32>
    tpu.vector_store %arg8[%c0_21, %c0_22, %c0_23, %c0_24], %29 {strides = array<i32>} : memref<1x1x8x128xf32, #tpu.memory_space<vmem>>, vector<1x1x8x128xf32>,
    %c0_25 = arith.constant 0 : index
    %c0_26 = arith.constant 0 : index
    %c0_27 = arith.constant 0 : index
    %c0_28 = arith.constant 0 : index
    %30 = vector.load %arg9[%c0_25, %c0_26, %c0_27, %c0_28] : memref<1x1x8x8xf32, #tpu.memory_space<vmem>>, vector<1x1x8x8xf32>
    %31 = vector.shape_cast %30 : vector<1x1x8x8xf32> to vector<8x8xf32>
    %32 = vector.shape_cast %25 : vector<8x8xf32> to vector<1x1x8x8xf32>
    tpu.vector_store %arg9[%c0_25, %c0_26, %c0_27, %c0_28], %32 {strides = array<i32>} : memref<1x1x8x8xf32, #tpu.memory_space<vmem>>, vector<1x1x8x8xf32>,
    return
  }
  func.func @transform_0(%arg0: i32, %arg1: i32, %arg2: i32) -> (i32, i32, i32, i32) {
    %c0_i32 = arith.constant 0 : i32
    %c0_i32_0 = arith.constant 0 : i32
    return %arg0, %arg1, %arg2, %c0_i32 : i32, i32, i32, i32
  }
  func.func @transform_1(%arg0: i32, %arg1: i32, %arg2: i32) -> (i32, i32, i32, i32) {
    %c0_i32 = arith.constant 0 : i32
    %c0_i32_0 = arith.constant 0 : i32
    %c0_i32_1 = arith.constant 0 : i32
    return %arg0, %arg1, %c0_i32, %c0_i32_0 : i32, i32, i32, i32
  }
  func.func @transform_2(%arg0: i32, %arg1: i32, %arg2: i32) -> (i32, i32, i32, i32) {
    %c0_i32 = arith.constant 0 : i32
    %c0_i32_0 = arith.constant 0 : i32
    %c0_i32_1 = arith.constant 0 : i32
    return %arg0, %arg1, %c0_i32, %c0_i32_0 : i32, i32, i32, i32
  }
  func.func @transform_3(%arg0: i32, %arg1: i32, %arg2: i32) -> (i32, i32, i32) {
    %c0_i32 = arith.constant 0 : i32
    %c0_i32_0 = arith.constant 0 : i32
    %c0_i32_1 = arith.constant 0 : i32
    return %arg1, %c0_i32, %c0_i32_0 : i32, i32, i32
  }
  func.func @transform_4(%arg0: i32, %arg1: i32, %arg2: i32) -> (i32, i32, i32) {
    %c0_i32 = arith.constant 0 : i32
    %c0_i32_0 = arith.constant 0 : i32
    %c0_i32_1 = arith.constant 0 : i32
    return %arg1, %c0_i32, %c0_i32_0 : i32, i32, i32
  }
  func.func @transform_5(%arg0: i32, %arg1: i32, %arg2: i32) -> (i32, i32, i32, i32) {
    %c0_i32 = arith.constant 0 : i32
    %c0_i32_0 = arith.constant 0 : i32
    return %arg0, %arg1, %arg2, %c0_i32 : i32, i32, i32, i32
  }
  func.func @transform_6(%arg0: i32, %arg1: i32, %arg2: i32) -> (i32, i32, i32, i32) {
    %c0_i32 = arith.constant 0 : i32
    %c0_i32_0 = arith.constant 0 : i32
    return %arg0, %arg1, %arg2, %c0_i32 : i32, i32, i32, i32
  }
}

</mosaic_0001>

<bundles_post_ra>
// kernel: attention_forward.6
= control target key start
LH: loop header
LB: loop body
LE: loop exit
PB: predicated region body
PF: predicated region fallthrough
CT: control target
= control target key end

     0   :  { %v136_v2 = vmov 128.0   ;;  %s188_s0 = inlined_call_operand.vmem [shape: f32[16,128], index: 0, kind: input, shape index: {}]   ;;  %s189_s1 = inlined_call_operand.vmem [shape: f32[1,128], index: 1, kind: input, shape index: {}]   ;;  %s190_s2 = inlined_call_operand.vmem [shape: f32[1,128], index: 2, kind: input, shape index: {}]   ;;  %s191_s3 = inlined_call_operand.vmem [shape: f32[1,128], index: 3, kind: input, shape index: {}]   ;;  %s192_s4 = inlined_call_operand.vmem [shape: f32[16,128], index: 4, kind: output, shape index: {}]  }
   0x1   :  { %v17_v0 = vld [vmem:[%s188_s0] sm:$0xff]  ;;  %v18_v1 = vld [vmem:[%s188_s0 + $0x8] sm:$0xff]  ;;  %126 = vrcp.f32 %v136_v2 }
   0x2   :  { %19 = vadd.xlane.f32.xlu0 %v17_v0  ;;  %v123_v52 = vld [vmem:[%s189_s1] ss:$0 sm:$0xff] }
   0x3   :  { %v124_v56 = vld [vmem:[%s190_s2] ss:$0 sm:$0xff] }
   0x4   :  { %v125_v59 = vld [vmem:[%s191_s3] ss:$0 sm:$0xff] }
   0x7   :  { %v127_v3 = vpop.eup %126 }
   0x8   :  { %v24_v4 = vmul.f32 128.0, %v127_v3  ;;  %vm28_vm0 = vweird.f32 %v127_v3 }
   0xa   :  { %21 = vadd.xlane.f32.xlu0 %v18_v1  ;;  %v25_v5 = vsub.f32 1.0, %v24_v4 }
   0xc   :  { %v26_v6 = vmul.f32 %v127_v3, %v25_v5 }
   0xe   :  { %v27_v7 = vadd.f32 %v127_v3, %v26_v6 }
  0x10   :  { %v29_v8 = vsel %vm28_vm0, %v127_v3, %v27_v7 }
  0x75   :  { %v20_v9 = vpop.xlane.xlu0 %19 }
  0x76   :  { %v30_v10 = vmul.f32 %v29_v8, %v20_v9 }
  0x78   :  { %v32_v11 = vsub.f32 %v17_v0, %v30_v10 }
  0x7a   :  { %v34_v12 = vmul.f32 %v32_v11, %v32_v11 }
  0x7c   :  { %36 = vadd.xlane.f32.xlu1 %v34_v12 }
  0x7d   :  { %v22_v13 = vpop.xlane.xlu0 %21 }
  0x7e   :  { %v31_v14 = vmul.f32 %v29_v8, %v22_v13 }
  0x80   :  { %v168_v15 = vsub.f32 %v18_v1, %v31_v14 }
  0x82   :  { %v35_v16 = vmul.f32 %v168_v15, %v168_v15 }
  0x84   :  { %38 = vadd.xlane.f32.xlu1 %v35_v16 }
  0xef   :  { %v37_v17 = vpop.xlane.xlu1 %36 }
  0xf0   :  { %v40_v18 = vmul.f32 %v37_v17, %v29_v8 }
  0xf2   :  { %v42_v19 = vadd.f32 1e-12, %v40_v18 }
  0xf4   :  { %128 = vrsqrt.f32 %v42_v19  ;;  %vm51_vm1 = vcmp.eq.f32.partialorder %v42_v19, inf  ;;  %v54_v33 = vand.u32 2147483648, %v42_v19  ;;  %vm53_vm2 = vcmp.eq.f32.partialorder %v42_v19, 0.0 }
  0xf7   :  { %v39_v20 = vpop.xlane.xlu1 %38 }
  0xf8   :  { %v41_v21 = vmul.f32 %v39_v20, %v29_v8 }
  0xfa   :  { %v129_v22 = vpop.eup %128  ;;  %v43_v23 = vadd.f32 1e-12, %v41_v21 }
  0xfb   :  { %v45_v24 = vmul.f32 %v129_v22, %v42_v19 }
  0xfc   :  { %130 = vrsqrt.f32 %v43_v23  ;;  %vm63_vm3 = vcmp.eq.f32.partialorder %v43_v23, inf  ;;  %v66_v41 = vand.u32 2147483648, %v43_v23  ;;  %vm65_vm4 = vcmp.eq.f32.partialorder %v43_v23, 0.0 }
  0xfd   :  { %v46_v25 = vmul.f32 %v129_v22, %v45_v24 }
  0xff   :  { %v47_v26 = vmul.f32 0.5, %v46_v25 }
 0x101   :  { %v48_v27 = vsub.f32 1.5, %v47_v26 }
 0x102   :  { %v131_v28 = vpop.eup %130 }
 0x103   :  { %v49_v29 = vmul.f32 %v129_v22, %v48_v27  ;;  %v57_v30 = vmul.f32 %v131_v28, %v43_v23 }
 0x105   :  { %v50_v31 = vmul.f32 %v49_v29, %v42_v19  ;;  %v58_v32 = vmul.f32 %v131_v28, %v57_v30 }
 0x107   :  { %v52_v34 = vsel %vm51_vm1, %v42_v19, %v50_v31  ;;  %v59_v35 = vmul.f32 0.5, %v58_v32 }
 0x108   :  { %v55_v36 = vsel %vm53_vm2, %v54_v33, %v52_v34 }
 0x109   :  { %132 = vrcp.f32 %v55_v36  ;;  %v60_v37 = vsub.f32 1.5, %v59_v35  ;;  %v79_v46 = vand.u32 2147483648, %v55_v36  ;;  %v77_v48 = vand.u32 2147483647, %v55_v36 }
 0x10a   :  { %vm73_vm6 = vweird.f32 %v55_v36 }
 0x10b   :  { %v61_v38 = vmul.f32 %v131_v28, %v60_v37  ;;  %v80_v50 = vor.u32 1.1754944e-38, %v79_v46  ;;  %vm78_vm8 = vcmp.eq.f32.partialorder %v77_v48, 8.507059e+37 }
 0x10d   :  { %v62_v39 = vmul.f32 %v61_v38, %v43_v23 }
 0x10f   :  { %v133_v40 = vpop.eup %132  ;;  %v64_v43 = vsel %vm63_vm3, %v43_v23, %v62_v39 }
 0x110   :  { %v69_v42 = vmul.f32 %v133_v40, %v55_v36  ;;  %v67_v44 = vsel %vm65_vm4, %v66_v41, %v64_v43  ;;  %vm74_vm5 = vweird.f32 %v133_v40 }
 0x111   :  { %134 = vrcp.f32 %v67_v44  ;;  %vm75_vm7 = vmor %vm73_vm6, %vm74_vm5  ;;  %v94_v61 = vand.u32 2147483648, %v67_v44  ;;  %v92_v63 = vand.u32 2147483647, %v67_v44  ;;  %vm88_vm10 = vweird.f32 %v67_v44 }
 0x112   :  { %v70_v45 = vsub.f32 1.0, %v69_v42 }
 0x113   :  { %v95_v3 = vor.u32 1.1754944e-38, %v94_v61  ;;  %vm93_vm12 = vcmp.eq.f32.partialorder %v92_v63, 8.507059e+37 }
 0x114   :  { %v71_v47 = vmul.f32 %v133_v40, %v70_v45 }
 0x116   :  { %v72_v49 = vadd.f32 %v133_v40, %v71_v47 }
 0x117   :  { %v135_v51 = vpop.eup %134 }
 0x118   :  { %v76_v53 = vsel %vm75_vm7, %v133_v40, %v72_v49  ;;  %v84_v55 = vmul.f32 %v135_v51, %v67_v44  ;;  %vm89_vm9 = vweird.f32 %v135_v51 }
 0x119   :  { %v81_v54 = vsel %vm78_vm8, %v80_v50, %v76_v53  ;;  %vm90_vm11 = vmor %vm88_vm10, %vm89_vm9 }
 0x11a   :  { %v82_v57 = vmul.f32 %v81_v54, %v32_v11  ;;  %v85_v58 = vsub.f32 1.0, %v84_v55 }
 0x11c   :  { %v102_v60 = vmul.f32 %v123_v52, %v82_v57  ;;  %v86_v62 = vmul.f32 %v135_v51, %v85_v58 }
 0x11e   :  { %v108_v0 = vadd.f32 %v124_v56, %v102_v60  ;;  %v87_v1 = vadd.f32 %v135_v51, %v86_v62 }
 0x120   :  { %v114_v2 = vmul.f32 %v125_v59, %v108_v0  ;;  %v91_v4 = vsel %vm90_vm11, %v135_v51, %v87_v1 }
 0x121   :  { %v96_v5 = vsel %vm93_vm12, %v95_v3, %v91_v4 }
 0x122   :  { %116 = vst [vmem:[%s192_s4] sm:$0xff] %v114_v2  ;;  %v97_v6 = vmul.f32 %v96_v5, %v168_v15 }
 0x124   :  { %v103_v7 = vmul.f32 %v123_v52, %v97_v6 }
 0x126   :  { %v109_v8 = vadd.f32 %v124_v56, %v103_v7 }
 0x128   :  { %v115_v9 = vmul.f32 %v125_v59, %v109_v8 }
 0x12a   :  { %117 = vst [vmem:[%s192_s4 + $0x8] sm:$0xff] %v115_v9 }

// kernel: attention_forward.5
= control target key start
LH: loop header
LB: loop body
LE: loop exit
PB: predicated region body
PF: predicated region fallthrough
CT: control target
= control target key end

     0   :  { %s165_s1 = inlined_call_operand.vmem [shape: f32[128,128], index: 1, kind: input, shape index: {}]   ;;  %s166_s2 = inlined_call_operand.vmem [shape: f32[1,128], index: 2, kind: input, shape index: {}]   ;;  %s167_s0 = inlined_call_operand.vmem [shape: f32[16,128], index: 0, kind: input, shape index: {}]   ;;  %s168_s3 = inlined_call_operand.vmem [shape: f32[16,128], index: 3, kind: output, shape index: {}]  }
   0x1   :  { %v31_v0 = vld [vmem:[%s165_s1 + $0x78] sm:$0xff]  ;;  %v30_v1 = vld [vmem:[%s165_s1 + $0x70] sm:$0xff]  ;;  %v29_v2 = vld [vmem:[%s165_s1 + $0x68] sm:$0xff] }
   0x2   :  { %36 = vmatpush.msra.mxu0 %v31_v0  ;;  %65 = vmatpush.msra.mxu1 %v31_v0  ;;  %v28_v3 = vld [vmem:[%s165_s1 + $0x60] sm:$0xff]  ;;  %v27_v4 = vld [vmem:[%s165_s1 + $0x58] sm:$0xff]  ;;  %v26_v5 = vld [vmem:[%s165_s1 + $0x50] sm:$0xff] }
   0x3   :  { %v25_v6 = vld [vmem:[%s165_s1 + $0x48] sm:$0xff]  ;;  %v24_v7 = vld [vmem:[%s165_s1 + $0x40] sm:$0xff]  ;;  %v23_v8 = vld [vmem:[%s165_s1 + $0x38] sm:$0xff] }
   0x4   :  { %37 = vmatpush.msra.mxu0 %v30_v1  ;;  %66 = vmatpush.msra.mxu1 %v30_v1  ;;  %v22_v9 = vld [vmem:[%s165_s1 + $0x30] sm:$0xff]  ;;  %v21_v10 = vld [vmem:[%s165_s1 + $0x28] sm:$0xff]  ;;  %v20_v11 = vld [vmem:[%s165_s1 + $0x20] sm:$0xff] }
   0x5   :  { %v19_v12 = vld [vmem:[%s165_s1 + $0x18] sm:$0xff]  ;;  %v18_v13 = vld [vmem:[%s165_s1 + $0x10] sm:$0xff]  ;;  %v17_v14 = vld [vmem:[%s165_s1 + $0x8] sm:$0xff] }
   0x6   :  { %38 = vmatpush.msra.mxu0 %v29_v2  ;;  %67 = vmatpush.msra.mxu1 %v29_v2  ;;  %v16_v15 = vld [vmem:[%s165_s1] sm:$0xff]  ;;  %v15_v17 = vld [vmem:[%s167_s0 + $0x8] sm:$0xff] }
   0x7   :  { %v14_v16 = vld [vmem:[%s167_s0] sm:$0xff] }
   0x8   :  { %39 = vmatpush.msra.mxu0 %v28_v3  ;;  %68 = vmatpush.msra.mxu1 %v28_v3  ;;  %v81_v18 = vld [vmem:[%s166_s2] ss:$0 sm:$0xff] }
   0xa   :  { %40 = vmatpush.msra.mxu0 %v27_v4  ;;  %69 = vmatpush.msra.mxu1 %v27_v4 }
   0xc   :  { %41 = vmatpush.msra.mxu0 %v26_v5  ;;  %70 = vmatpush.msra.mxu1 %v26_v5 }
   0xe   :  { %42 = vmatpush.msra.mxu0 %v25_v6  ;;  %71 = vmatpush.msra.mxu1 %v25_v6 }
  0x10   :  { %43 = vmatpush.msra.mxu0 %v24_v7  ;;  %72 = vmatpush.msra.mxu1 %v24_v7 }
  0x12   :  { %44 = vmatpush.msra.mxu0 %v23_v8  ;;  %73 = vmatpush.msra.mxu1 %v23_v8 }
  0x14   :  { %45 = vmatpush.msra.mxu0 %v22_v9  ;;  %74 = vmatpush.msra.mxu1 %v22_v9 }
  0x16   :  { %46 = vmatpush.msra.mxu0 %v21_v10  ;;  %75 = vmatpush.msra.mxu1 %v21_v10 }
  0x18   :  { %47 = vmatpush.msra.mxu0 %v20_v11  ;;  %76 = vmatpush.msra.mxu1 %v20_v11 }
  0x1a   :  { %48 = vmatpush.msra.mxu0 %v19_v12  ;;  %77 = vmatpush.msra.mxu1 %v19_v12 }
  0x1c   :  { %49 = vmatpush.msra.mxu0 %v18_v13  ;;  %78 = vmatpush.msra.mxu1 %v18_v13 }
  0x1e   :  { %50 = vmatpush.msra.mxu0 %v17_v14  ;;  %79 = vmatpush.msra.mxu1 %v17_v14 }
  0x20   :  { %51 = vmatpush.msra.mxu0 %v16_v15  ;;  %80 = vmatpush.msra.mxu1 %v16_v15 }
  0x21   :  { %52 = vmatmul.f32.vlgmr.msra.gmra.mxu0 %v14_v16  ;;  %55 = vmatmul.f32.vlgmr.msra.gmra.mxu1 %v15_v17 }
  0x9e   :  { %v53_v19 = vpop.f32.mrf.mxu0  ;;  %v56_v20 = vpop.f32.mrf.mxu1 }
  0x9f   :  { %v54_v21 = vadd.f32 %v81_v18, %v53_v19  ;;  %v57_v22 = vadd.f32 %v81_v18, %v56_v20 }
  0xa1   :  { %59 = vst [vmem:[%s168_s3] sm:$0xff] %v54_v21 }
  0xa2   :  { %60 = vst [vmem:[%s168_s3 + $0x8] sm:$0xff] %v57_v22 }

// kernel: attention_forward.4
= control target key start
LH: loop header
LB: loop body
LE: loop exit
PB: predicated region body
PF: predicated region fallthrough
CT: control target
= control target key end

     0   :  { %s266_s2 = inlined_call_operand.vmem [shape: f32[128,128], index: 2, kind: input, shape index: {}]   ;;  %s267_s1 = inlined_call_operand.vmem [shape: f32[128,128], index: 1, kind: input, shape index: {}]   ;;  %s268_s0 = inlined_call_operand.vmem [shape: f32[1,128], index: 0, kind: input, shape index: {}]   ;;  %s269_s4 = inlined_call_operand.vmem [shape: f32[1,128], index: 4, kind: input, shape index: {}]   ;;  %s270_s3 = inlined_call_operand.vmem [shape: f32[1,128], index: 3, kind: input, shape index: {}]   ;;  %s271_s5 = inlined_call_operand.vmem [shape: f32[1,128], index: 5, kind: output, shape index: {}]  }
   0x1   :  { %v73_v0 = vld [vmem:[%s266_s2 + $0x78] sm:$0xff]  ;;  %v72_v1 = vld [vmem:[%s266_s2 + $0x70] sm:$0xff]  ;;  %v71_v2 = vld [vmem:[%s266_s2 + $0x68] sm:$0xff] }
   0x2   :  { %75 = vmatpush.msra.mxu1 %v73_v0  ;;  %v36_v3 = vld [vmem:[%s267_s1 + $0x78] sm:$0xff]  ;;  %v70_v4 = vld [vmem:[%s266_s2 + $0x60] sm:$0xff]  ;;  %v35_v5 = vld [vmem:[%s267_s1 + $0x70] sm:$0xff] }
   0x3   :  { %38 = vmatpush.msra.mxu0 %v36_v3  ;;  %v34_v6 = vld [vmem:[%s267_s1 + $0x68] sm:$0xff]  ;;  %v69_v7 = vld [vmem:[%s266_s2 + $0x58] sm:$0xff]  ;;  %v33_v8 = vld [vmem:[%s267_s1 + $0x60] sm:$0xff] }
   0x4   :  { %76 = vmatpush.msra.mxu1 %v72_v1  ;;  %v68_v9 = vld [vmem:[%s266_s2 + $0x50] sm:$0xff]  ;;  %v32_v10 = vld [vmem:[%s267_s1 + $0x58] sm:$0xff]  ;;  %v67_v11 = vld [vmem:[%s266_s2 + $0x48] sm:$0xff] }
   0x5   :  { %39 = vmatpush.msra.mxu0 %v35_v5  ;;  %v31_v12 = vld [vmem:[%s267_s1 + $0x50] sm:$0xff]  ;;  %v66_v13 = vld [vmem:[%s266_s2 + $0x40] sm:$0xff]  ;;  %v30_v14 = vld [vmem:[%s267_s1 + $0x48] sm:$0xff] }
   0x6   :  { %77 = vmatpush.msra.mxu1 %v71_v2  ;;  %v65_v15 = vld [vmem:[%s266_s2 + $0x38] sm:$0xff]  ;;  %v29_v16 = vld [vmem:[%s267_s1 + $0x40] sm:$0xff]  ;;  %v64_v17 = vld [vmem:[%s266_s2 + $0x30] sm:$0xff] }
   0x7   :  { %40 = vmatpush.msra.mxu0 %v34_v6  ;;  %v28_v18 = vld [vmem:[%s267_s1 + $0x38] sm:$0xff]  ;;  %v63_v19 = vld [vmem:[%s266_s2 + $0x28] sm:$0xff]  ;;  %v27_v20 = vld [vmem:[%s267_s1 + $0x30] sm:$0xff] }
   0x8   :  { %78 = vmatpush.msra.mxu1 %v70_v4  ;;  %v62_v21 = vld [vmem:[%s266_s2 + $0x20] sm:$0xff]  ;;  %v26_v22 = vld [vmem:[%s267_s1 + $0x28] sm:$0xff]  ;;  %v61_v23 = vld [vmem:[%s266_s2 + $0x18] sm:$0xff] }
   0x9   :  { %41 = vmatpush.msra.mxu0 %v33_v8  ;;  %v25_v24 = vld [vmem:[%s267_s1 + $0x20] sm:$0xff]  ;;  %v60_v25 = vld [vmem:[%s266_s2 + $0x10] sm:$0xff]  ;;  %v24_v26 = vld [vmem:[%s267_s1 + $0x18] sm:$0xff] }
   0xa   :  { %79 = vmatpush.msra.mxu1 %v69_v7  ;;  %v59_v27 = vld [vmem:[%s266_s2 + $0x8] sm:$0xff]  ;;  %v23_v28 = vld [vmem:[%s267_s1 + $0x10] sm:$0xff]  ;;  %v58_v29 = vld [vmem:[%s266_s2] sm:$0xff] }
   0xb   :  { %42 = vmatpush.msra.mxu0 %v32_v10  ;;  %v20_v30 = vld [vmem:[%s268_s0] sm:$0x1]  ;;  %v22_v31 = vld [vmem:[%s267_s1 + $0x8] sm:$0xff] }
   0xc   :  { %80 = vmatpush.msra.mxu1 %v68_v9  ;;  %v21_v32 = vld [vmem:[%s267_s1] sm:$0xff] }
   0xd   :  { %43 = vmatpush.msra.mxu0 %v31_v12  ;;  %v74_v33 = vld [vmem:[%s269_s4] sm:$0x1] }
   0xe   :  { %81 = vmatpush.msra.mxu1 %v67_v11  ;;  %v37_v39 = vld [vmem:[%s270_s3] sm:$0x1] }
   0xf   :  { %44 = vmatpush.msra.mxu0 %v30_v14 }
  0x10   :  { %82 = vmatpush.msra.mxu1 %v66_v13 }
  0x11   :  { %45 = vmatpush.msra.mxu0 %v29_v16 }
  0x12   :  { %83 = vmatpush.msra.mxu1 %v65_v15 }
  0x13   :  { %46 = vmatpush.msra.mxu0 %v28_v18 }
  0x14   :  { %84 = vmatpush.msra.mxu1 %v64_v17 }
  0x15   :  { %47 = vmatpush.msra.mxu0 %v27_v20 }
  0x16   :  { %85 = vmatpush.msra.mxu1 %v63_v19 }
  0x17   :  { %48 = vmatpush.msra.mxu0 %v26_v22 }
  0x18   :  { %86 = vmatpush.msra.mxu1 %v62_v21 }
  0x19   :  { %49 = vmatpush.msra.mxu0 %v25_v24 }
  0x1a   :  { %87 = vmatpush.msra.mxu1 %v61_v23 }
  0x1b   :  { %50 = vmatpush.msra.mxu0 %v24_v26 }
  0x1c   :  { %88 = vmatpush.msra.mxu1 %v60_v25 }
  0x1d   :  { %51 = vmatpush.msra.mxu0 %v23_v28 }
  0x1e   :  { %89 = vmatpush.msra.mxu1 %v59_v27 }
  0x1f   :  { %52 = vmatpush.msra.mxu0 %v22_v31 }
  0x20   :  { %90 = vmatpush.msra.mxu1 %v58_v29 }
  0x21   :  { %91 = vmatmul.f32.vlgmr.msra.gmra.mxu1 %v20_v30  ;;  %53 = vmatpush.msra.mxu0 %v21_v32 }
  0x22   :  { %54 = vmatmul.f32.vlgmr.msra.gmra.mxu0 %v20_v30 }
  0x9e   :  { %v92_v34 = vpop.f32.mrf.mxu1 }
  0x9f   :  { %v93_v35 = vadd.f32 %v92_v34, %v74_v33  ;;  %v55_v40 = vpop.f32.mrf.mxu0 }
  0xa0   :  { %v56_v41 = vadd.f32 %v55_v40, %v37_v39 }
  0xa1   :  { %v121_v36 = vmul.f32 -1.442695, %v93_v35 }
  0xa3   :  { %122 = vpow2.f32 %v121_v36 }
  0xa9   :  { %v123_v37 = vpop.eup %122 }
  0xaa   :  { %v98_v38 = vadd.f32 1.0, %v123_v37 }
  0xac   :  { %124 = vrcp.f32 %v98_v38  ;;  %v110_v45 = vand.u32 2147483648, %v98_v38  ;;  %v108_v47 = vand.u32 2147483647, %v98_v38  ;;  %vm104_vm1 = vweird.f32 %v98_v38 }
  0xad   :  { %126 = vtanh.f32 %v56_v41 }
  0xae   :  { %v111_v50 = vor.u32 1.1754944e-38, %v110_v45  ;;  %vm109_vm3 = vcmp.eq.f32.partialorder %v108_v47, 8.507059e+37 }
  0xb2   :  { %v125_v42 = vpop.eup %124 }
  0xb3   :  { %v100_v43 = vmul.f32 %v125_v42, %v98_v38  ;;  %vm105_vm0 = vweird.f32 %v125_v42  ;;  %v127_v49 = vpop.eup %126 }
  0xb4   :  { %vm106_vm2 = vmor %vm104_vm1, %vm105_vm0 }
  0xb5   :  { %v101_v44 = vsub.f32 1.0, %v100_v43 }
  0xb7   :  { %v102_v46 = vmul.f32 %v125_v42, %v101_v44 }
  0xb9   :  { %v103_v48 = vadd.f32 %v125_v42, %v102_v46 }
  0xbb   :  { %v107_v51 = vsel %vm106_vm2, %v125_v42, %v103_v48 }
  0xbc   :  { %v112_v52 = vsel %vm109_vm3, %v111_v50, %v107_v51 }
  0xbd   :  { %v115_v53 = vmul.f32 %v127_v49, %v112_v52 }
  0xbf   :  { %116 = vst [vmem:[%s271_s5] sm:$0x1] %v115_v53 }

// kernel: attention_forward.7
= control target key start
LH: loop header
LB: loop body
LE: loop exit
PB: predicated region body
PF: predicated region fallthrough
CT: control target
= control target key end

     0   :  { %12 = vsyncpa [#allocation3], 0  ;;  %s1003_s0 = inlined_call_operand.vmem [shape: f32[2,1,8,128], index: 0, kind: input, shape index: {}]   ;;  %s1004_s1 = inlined_call_operand.vmem [shape: f32[2,1,8,128], index: 1, kind: input, shape index: {}]   ;;  %s1005_s2 = inlined_call_operand.vmem [shape: f32[2,1,8,128], index: 2, kind: input, shape index: {}]   ;;  %s1006_s3 = inlined_call_operand.vmem [shape: f32[1,1,128], index: 3, kind: input, shape index: {}]   ;;  %s1007_s4 = inlined_call_operand.vmem [shape: f32[1,1,128], index: 4, kind: input, shape index: {}]   ;;  %s1008_s5 = inlined_call_operand.vmem [shape: f32[2,1,8,128], index: 5, kind: output, shape index: {0}]   ;;  %s1009_s6 = inlined_call_operand.hbm [shape: f32[2,1,8,8], index: 6, kind: output, shape index: {1}]  }
   0x1   :  { %14 = vsyncpa [#allocation3 + $0x1], 0  ;;  %s881_s21 = smov 0   ;;  %s883_s22 = smov 0  }
   0x2   :  { %s885_s23 = smov 0   ;;  %s887_s24 = smov 0  }
   0x3   :  { %s889_s25 = smov 0   ;;  %s891_s26 = smov 0  }
   0x4 LB: > { %s688_s27 = sadd.s32 4294967295, %s844_s26   ;;  %s689_s28 = sadd.s32 4294967294, %s844_s26   ;;  %s844_s26 = sphi %s891_s26, %s20_s26   ;;  %s840_s25 = sphi %s889_s25, %s1016_s25   ;;  %s836_s24 = sphi %s887_s24, %s1015_s24   ;;  %s832_s23 = sphi %s885_s23, %s1014_s23   ;;  %s828_s22 = sphi %s883_s22, %s1013_s22   ;;  %s824_s21 = sphi %s881_s21, %s1012_s21  }
   0x5   : > { %s39_s29 = sadd.s32 1, %s840_s25  ;;  %s218_s30 = sadd.s32 1, %s832_s23 }
   0x6   : > { %p41_p0 = scmp.ge.s32.totalorder %s39_s29, 2  ;;  %p228_p1 = scmp.ne.s32.totalorder %s832_s23, %s828_s22 }
   0x7   : > { %p229_p2 = scmp.eq.s32.totalorder %s688_s27, 1  ;;  %p234_p3 = scmp.ne.s32.totalorder %s828_s22, %s824_s21 }
   0x8   : > { %s1018_s29 = smov (%p41_p0, %s39_s29), 0  ;;  %p235_p5 = scmp.eq.s32.totalorder %s689_s28, 1 }
   0x9   : > { %p921_p4 = por %p229_p2, %p228_p1  ;;  %s211_s8 = ssub.s32 %s840_s25, %s1018_s29 }
   0xa   : > { %p694_p6 = scmp.ge.s32.totalorder %s844_s26, 1  ;;  %p216_p7 = scmp.eq.s32.totalorder %s211_s8, 0 }
   0xb   : > { %p928_p8 = por %p235_p5, %p234_p3  ;;  %p298_p9 = scmp.lt.s32.totalorder %s844_s26, 3 }
   0xc   : > { %s934_s10 = scalar_select %p216_p7, %s832_s23, %s218_s30  }
   0xd   : > { %p299_p10 = pnand %p694_p6, %p298_p9 }
   0xe   : > { %p363_p11 = scmp.lt.s32.totalorder (!%p299_p10), %s836_s24, 1  ;;  %s360_s12 = sand.u32 (!%p299_p10), 1, %s828_s22  }
   0xf   : > { %302 = sbr.rel (%p299_p10) target bundleno = 549 (0x225), region = 40  ;;  %s695_s13 = sshll.u32 (!%p299_p10), %s360_s12, 3 }
  0x10   : > { %s702_s15 = sshll.u32 (!%p299_p10), %s836_s24, 3  ;;  %s362_s19 = scalar_lea.vmem (!%p299_p10), [#allocation2], %s695_s13 }
  0x11   : > { %s513_s18 = scalar_lea.hbm (!%p299_p10), %s1009_s6, %s702_s15  ;;  %s786_s13 = scalar_lea.hbm (!%p299_p10), %s1009_s6, 16 }
  0x12   : > { %s517_s27 = sshll.u32 (!%p299_p10), %s513_s18, 4  ;;  %s518_s27 = int_to_ptr.hbm [resolvable:$true] %s517_s27 }
  0x13   : > { %s780_s28 = sshra.s32 (!%p299_p10), %s518_s27, 4  ;;  %s781_s28 = int_to_ptr.hbm [resolvable:$true] %s780_s28 }
  0x14   : > { %s364_s11 = scalar_select %p363_p11, %s836_s24, 1  ;;  %v760_v0 = vld [vmem:[%s1006_s3] ss:$0 sm:$0xff]  ;;  %vm437_vm0 = vcmask 64512  }
  0x15   : > { %v761_v13 = vld [vmem:[%s1007_s4] ss:$0 sm:$0xff]  ;;  %s498_s24 = scalar_lea.sflag [#allocation3], %s360_s12  ;;  %p787_p1 = scmp.lt.s32.totalorder %s781_s28, %s1009_s6 }
  0x16   : > { %s941_s14 = sshll.u32 %s364_s11, 3 }
  0x17   : > { %s379_s17 = scalar_lea.vmem %s1004_s1, %s941_s14  ;;  %s372_s20 = scalar_lea.vmem %s1003_s0, %s941_s14 }
  0x18   : > { %v404_v1 = vld [vmem:[%s379_s17] sm:$0xff]  ;;  %s386_s30 = scalar_lea.vmem %s1005_s2, %s941_s14 }
  0x19   : > { %v409_v2 = vmul.f32 %v760_v0, %v404_v1  ;;  %v403_v3 = vld [vmem:[%s372_s20] sm:$0xff]  ;;  %s515_s20 = sshll.u32 %s362_s19, 4  ;;  %s516_s20 = int_to_ptr.vmem [resolvable:$true] %s515_s20 }
  0x1a   : > { %v410_v12 = vld [vmem:[%s386_s30] sm:$0xff]  ;;  %s782_s30 = scalar_lea.hbm %s781_s28, 8 }
  0x1b   : > { %431 = vmatpush.xpose.msra.mxu0 %v409_v2  ;;  %v415_v14 = vmul.f32 %v761_v13, %v410_v12  ;;  %p783_p12 = scmp.ne.s32.totalorder %s781_s28, %s782_s30  ;;  %p788_p2 = scmp.lt.s32.totalorder %s786_s13, %s782_s30 }
  0x1d   : > { %480 = vmatpush.msra.mxu1 %v415_v14  ;;  %p784_p13 = pnand %p783_p12, %p921_p4  ;;  %p789_p3 = por %p788_p2, %p787_p1 }
  0x1e   : > { %432 = vmatmul.f32.vlgmr.msra.gmra.mxu0 %v403_v3 }
  0x1f   : > { %p785_p0 = pneg %p784_p13 }
  0x21   : > { %p790_p5 = pnand %p789_p3, %p785_p0 }
  0x9b   : > { %v433_v4 = vpop.f32.mrf.mxu0 }
  0x9c   : > { %v436_v5 = vmul.f32 0.088388346, %v433_v4 }
  0x9e   : > { %v438_v6 = vsel %vm437_vm0, %v436_v5, -inf }
  0x9f   : > { %439 = vmax.xlane.f32.xlu0 %v438_v6 }
 0x112   : > { %v440_v7 = vpop.xlane.xlu0 %439 }
 0x113   : > { %v441_v8 = vsub.f32 %v436_v5, %v440_v7 }
 0x115   : > { %v442_v9 = vmul.f32 1.442695, %v441_v8 }
 0x117   : > { %762 = vpow2.f32 %v442_v9 }
 0x11d   : > { %v763_v10 = vpop.eup %762 }
 0x11e   : > { %v444_v11 = vsel %vm437_vm0, %v763_v10, 0.0 }
 0x11f   : > { %445 = vadd.xlane.f32.xlu0 %v444_v11 }
 0x192   : > { %v446_v15 = vpop.xlane.xlu0 %445 }
 0x193   : > { %764 = vrcp.f32 %v446_v15  ;;  %v458_v19 = vand.u32 2147483648, %v446_v15  ;;  %v456_v21 = vand.u32 2147483647, %v446_v15  ;;  %vm452_vm2 = vweird.f32 %v446_v15 }
 0x195   : > { %v459_v23 = vor.u32 1.1754944e-38, %v458_v19  ;;  %vm457_vm4 = vcmp.eq.f32.partialorder %v456_v21, 8.507059e+37 }
 0x199   : > { %v765_v16 = vpop.eup %764 }
 0x19a   : > { %v448_v17 = vmul.f32 %v765_v16, %v446_v15  ;;  %vm453_vm1 = vweird.f32 %v765_v16 }
 0x19b   : > { %vm454_vm3 = vmor %vm452_vm2, %vm453_vm1 }
 0x19c   : > { %v449_v18 = vsub.f32 1.0, %v448_v17 }
 0x19e   : > { %v450_v20 = vmul.f32 %v765_v16, %v449_v18 }
 0x1a0   : > { %v451_v22 = vadd.f32 %v765_v16, %v450_v20 }
 0x1a2   : > { %v455_v24 = vsel %vm454_vm3, %v765_v16, %v451_v22 }
 0x1a3   : > { %v460_v25 = vsel %vm457_vm4, %v459_v23, %v455_v24 }
 0x1a4   : > { %v461_v26 = vmul.f32 %v763_v10, %v460_v25 }
 0x1a6   : > { %700 = vmatmul.msk.f32.vlgmr.msra.gmra.mxu1 %vm437_vm0, %v461_v26  ;;  %486 = vst.msk [vmem:[%s362_s19] sm:$0xff] %vm437_vm0, %v461_v26 }
 0x1a7   : > { %793 = shalt.err (!%p790_p5)
}
 0x1a8   : > { %705 = dma.vmem_to_hbm [thread:$0]  (%p921_p4), %s516_s20, 128, %s518_s27, %s498_s24  }
 0x1a9   : > { %s402_s18 = scalar_lea.vmem %s1008_s5, %s941_s14 }
 0x223   : > { %v482_v27 = vpop.f32.mrf.mxu1 }
 0x224   : > { %485 = vst [vmem:[%s402_s18] sm:$0xff] %v482_v27 }
 0x225 PF: > { %p711_p6 = scmp.ge.s32.totalorder %s844_s26, 2  ;;  %s542_s19 = sand.u32 1, %s824_s21  }
 0x226   : > { %s543_s28 = scalar_lea.sflag [#allocation3], %s542_s19 }
 0x227   : > { %p708_p7 = pnand %p711_p6, %p928_p8 }
 0x229   : > { %p709_p9 = pneg %p708_p7 }
 0x22b   : > { %819 = dma.done.wait (%p709_p9), %s543_s28, 128  }
 0x22c   : > { %821 = vsyncadd (%p709_p9), %s543_s28, 4294967168  ;;  %s20_s26 = sadd.s32 1, %s844_s26   ;;  %s1012_s21 = smov %s828_s22 }
 0x22d   : > { %p17_p4 = scmp.ge.s32.totalorder %s20_s26, 4   ;;  %s1013_s22 = smov %s832_s23 }
 0x22e   : > { %s1014_s23 = smov %s934_s10  ;;  %s1015_s24 = smov %s840_s25 }
 0x22f   : > { %s1016_s25 = smov %s1018_s29  ;;  %19 = sbr.rel (!%p17_p4) target bundleno = 4 (0x4), region = 99 }
 0x234   :  { %549 = vsyncpa [#allocation3], 1 }
 0x235   :  { %551 = vsyncpa [#allocation3 + $0x1], 1 }

</bundles_post_ra>
